<compile_context>
chip_gen: v6e
topology: v6e:2x2x1
jax: 0.10.0
libtpu: 0.0.40
codegen_flags: <defaults>
</compile_context>

<pallas_src>
import jax
import jax.numpy as jnp
from jax.experimental import pallas as pl
from jax.experimental.pallas import tpu as pltpu


def _serf_kernel(x_ref, o_ref):
    x = x_ref[...].astype(jnp.float32)
    # t = exp(-|x|) in (0, 1]  -> single EUP transcendental, never overflows.
    t = jnp.exp(-jnp.abs(x))
    t2 = t * t
    pos = x >= 0.0
    # tanh(softplus(x)) = (e^{2x} + 2e^x) / (e^{2x} + 2e^x + 2), rescaled by
    # e^{-2*max(x,0)} so everything is expressed in t (no overflow):
    #   x >= 0: (1   + 2t) / (1   + 2t + 2t^2)
    #   x <  0: (t^2 + 2t) / (t^2 + 2t + 2)
    p = jnp.where(pos, 1.0, t2)
    q = jnp.where(pos, t2, 1.0)
    num = p + 2.0 * t
    den = num + 2.0 * q
    inv = pl.reciprocal(den, approx=True)      # EUP slot, ~free next to the exp
    inv = inv * (2.0 - den * inv)              # one Newton step -> ~f32 accuracy (VPU only)
    o_ref[...] = (x * num * inv).astype(o_ref.dtype)


def serf(x):
    """Apply SERF elementwise to an array of any shape (NCHW expected)."""
    orig_shape = x.shape
    orig_dtype = x.dtype
    total = x.size
    itemsize = x.dtype.itemsize

    flat = x.reshape(-1)

    # Pick the widest lane-dense last dim that divides the element count
    # (avoids any padding copy in the common case).
    width = None
    for w in (4096, 2048, 1024, 512, 256, 128):
        if total % w == 0:
            width = w
            break

    padded_total = total
    if width is None:
        # Rare fallback for sizes not divisible by 128: pad once, slice once.
        width = 128
        padded_total = pl.cdiv(total, width) * width
        flat = jnp.pad(flat, (0, padded_total - total))

    rows = padded_total // width
    x2d = flat.reshape(rows, width)

    # ~2 MiB per block => 4 double-buffered (in+out) blocks ~= 8 MiB VMEM,
    # safely under the default scoped VMEM limit on every chip generation.
    target_block_bytes = 2 * 1024 * 1024
    rows_per_block = max(1, target_block_bytes // (width * itemsize))
    if rows_per_block >= rows:
        block_rows = rows                         # whole slab = one block (full-dim block is legal)
    else:
        block_rows = max(8, (rows_per_block // 8) * 8)  # sublane-aligned

    grid = (pl.cdiv(rows, block_rows),)

    out2d = pl.pallas_call(
        _serf_kernel,
        out_shape=jax.ShapeDtypeStruct((rows, width), orig_dtype),
        grid_spec=pltpu.PrefetchScalarGridSpec(
            num_scalar_prefetch=0,
            grid=grid,
            in_specs=[pl.BlockSpec((block_rows, width), lambda i: (i, 0))],
            out_specs=pl.BlockSpec((block_rows, width), lambda i: (i, 0)),
        ),
        compiler_params=pltpu.CompilerParams(
            dimension_semantics=("parallel",),
        ),
        cost_estimate=pl.CostEstimate(
            flops=12 * padded_total,
            transcendentals=2 * padded_total,
            bytes_accessed=2 * padded_total * itemsize,
        ),
    )(x2d)

    if padded_total != total:
        return out2d.reshape(-1)[:total].reshape(orig_shape)
    return out2d.reshape(orig_shape)


if __name__ == "__main__":
    key = jax.random.PRNGKey(0)
    x = jax.random.normal(key, (2, 4, 16, 16), dtype=jnp.float32)  # NCHW

    y = serf(x)
    jax.block_until_ready(y)

    # Reference check in plain JAX (same math as torch: x * tanh(softplus(x)))
    ref = x * jnp.tanh(jax.nn.softplus(x))
    assert y.shape == x.shape and y.dtype == x.dtype
    assert jnp.allclose(y, ref, atol=1e-5, rtol=1e-5)

    print("KERNEL_OK")
</pallas_src>

<mosaic_0001>
module attributes {stable_mosaic.version = 11 : i64} {
  func.func @_serf_kernel(%arg0: i32, %arg1: memref<1x2048xf32, #tpu.memory_space<vmem>>, %arg2: memref<1x2048xf32, #tpu.memory_space<vmem>>) attributes {dimension_semantics = [#tpu.dimension_semantics<parallel>], iteration_bounds = array<i64: 1>, scalar_prefetch = 0 : i64, scratch_operands = 0 : i64, tpu.core_type = #tpu.core_type<tc>, window_params = [{transform_indices = @transform_0, window_bounds = array<i64: 1, 2048>}, {transform_indices = @transform_1, window_bounds = array<i64: 1, 2048>}]} {
    %c0 = arith.constant 0 : index
    %c0_0 = arith.constant 0 : index
    %0 = vector.load %arg1[%c0, %c0_0] : memref<1x2048xf32, #tpu.memory_space<vmem>>, vector<1x2048xf32>
    %1 = math.absf %0 : vector<1x2048xf32>
    %cst = arith.constant 0.000000e+00 : f32
    %2 = vector.broadcast %cst : f32 to vector<1x2048xf32>
    %3 = arith.subf %2, %1 : vector<1x2048xf32>
    %4 = math.exp %3 : vector<1x2048xf32>
    %5 = arith.mulf %4, %4 : vector<1x2048xf32>
    %cst_1 = arith.constant 0.000000e+00 : f32
    %6 = vector.broadcast %cst_1 : f32 to vector<1x2048xf32>
    %7 = arith.cmpf oge, %0, %6 : vector<1x2048xf32>
    %cst_2 = arith.constant 1.000000e+00 : f32
    %8 = vector.broadcast %cst_2 : f32 to vector<1x2048xf32>
    %9 = arith.select %7, %8, %5 : vector<1x2048xi1>, vector<1x2048xf32>
    %cst_3 = arith.constant 1.000000e+00 : f32
    %10 = vector.broadcast %cst_3 : f32 to vector<1x2048xf32>
    %11 = arith.select %7, %5, %10 : vector<1x2048xi1>, vector<1x2048xf32>
    %cst_4 = arith.constant 2.000000e+00 : f32
    %12 = vector.broadcast %cst_4 : f32 to vector<1x2048xf32>
    %13 = arith.mulf %12, %4 : vector<1x2048xf32>
    %14 = arith.addf %9, %13 : vector<1x2048xf32>
    %cst_5 = arith.constant 2.000000e+00 : f32
    %15 = vector.broadcast %cst_5 : f32 to vector<1x2048xf32>
    %16 = arith.mulf %15, %11 : vector<1x2048xf32>
    %17 = arith.addf %14, %16 : vector<1x2048xf32>
    %18 = tpu.reciprocal %17 {approx = true} : vector<1x2048xf32> -> vector<1x2048xf32>
    %19 = arith.mulf %17, %18 : vector<1x2048xf32>
    %cst_6 = arith.constant 2.000000e+00 : f32
    %20 = vector.broadcast %cst_6 : f32 to vector<1x2048xf32>
    %21 = arith.subf %20, %19 : vector<1x2048xf32>
    %22 = arith.mulf %18, %21 : vector<1x2048xf32>
    %23 = arith.mulf %0, %14 : vector<1x2048xf32>
    %24 = arith.mulf %23, %22 : vector<1x2048xf32>
    %c0_7 = arith.constant 0 : index
    %c0_8 = arith.constant 0 : index
    %25 = vector.load %arg2[%c0_7, %c0_8] : memref<1x2048xf32, #tpu.memory_space<vmem>>, vector<1x2048xf32>
    tpu.vector_store %arg2[%c0_7, %c0_8], %24 {strides = array<i32>} : memref<1x2048xf32, #tpu.memory_space<vmem>>, vector<1x2048xf32>,
    return
  }
  func.func @transform_0(%arg0: i32) -> (i32, i32) {
    %c0_i32 = arith.constant 0 : i32
    %c0_i32_0 = arith.constant 0 : i32
    return %arg0, %c0_i32 : i32, i32
  }
  func.func @transform_1(%arg0: i32) -> (i32, i32) {
    %c0_i32 = arith.constant 0 : i32
    %c0_i32_0 = arith.constant 0 : i32
    return %arg0, %c0_i32 : i32, i32
  }
}

</mosaic_0001>

<bundles_post_ra>
// kernel: tpu_custom_call.1
= control target key start
LH: loop header
LB: loop body
LE: loop exit
PB: predicated region body
PF: predicated region fallthrough
CT: control target
= control target key end

     0   :  { %6 = vsyncpa [#allocation3], 0  ;;  %s148_s0 = inlined_call_operand.hbm [shape: f32[1,2048], index: 0, kind: input, shape index: {}]   ;;  %s149_s1 = inlined_call_operand.hbm [shape: f32[1,2048], index: 1, kind: output, shape index: {}]  }
   0x1   :  { %7 = vsyncpa [#allocation4], 0  ;;  %s130_s6 = smov [#allocation2]  }
   0x2   :  { %s14_s7 = sshll.u32 %s130_s6, 4  ;;  %s15_s7 = int_to_ptr.vmem [resolvable:$true] %s14_s7 }
   0x3   :  { %s94_s8 = scalar_lea.vmem %s15_s7, 256  ;;  %p99_p1 = scmp.lt.s32.totalorder %s15_s7, %s15_s7 }
   0x4   :  { %p95_p0 = scmp.ne.s32.totalorder %s15_s7, %s94_s8  ;;  %p100_p2 = scmp.lt.s32.totalorder %s94_s8, %s94_s8 }
   0x6   :  { %p101_p3 = por %p100_p2, %p99_p1 }
   0x8   :  { %p102_p4 = pnand %p101_p3, %p95_p0 }
   0xa   :  { %105 = shalt.err (!%p102_p4)
}
   0xb   :  { %17 = dma.hbm_to_vmem [thread:$0]  %s148_s0, 256, %s15_s7, [#allocation3]  }
   0xc   :  { %126 = dma.done.wait [#allocation3], 256  }
   0xd   :  { %127 = vsyncadd [#allocation3], 4294967040  ;;  %v21_v0 = vld [vmem:[#allocation2] sm:$0xff]  ;;  %v22_v1 = vld [vmem:[#allocation2 + $0x8] sm:$0xff]  ;;  %s131_s0 = smov [#allocation5]  }
   0xe   :  { %v23_v2 = vand.u32 2147483647, %v21_v0  ;;  %v24_v3 = vand.u32 2147483647, %v22_v1  ;;  %vm33_vm0 = vcmp.ge.f32.partialorder %v21_v0, 0.0  ;;  %vm34_vm1 = vcmp.ge.f32.partialorder %v22_v1, 0.0 }
   0xf   :  { %s67_s11 = sshll.u32 %s131_s0, 4  ;;  %s68_s11 = int_to_ptr.vmem [resolvable:$true] %s67_s11 }
  0x10   :  { %v25_v4 = vsub.f32 0.0, %v23_v2  ;;  %v26_v5 = vsub.f32 0.0, %v24_v3  ;;  %s106_s12 = scalar_lea.vmem %s68_s11, 256  ;;  %p111_p6 = scmp.lt.s32.totalorder %s68_s11, %s68_s11 }
  0x11   :  { %p107_p5 = scmp.ne.s32.totalorder %s68_s11, %s106_s12  ;;  %p112_p7 = scmp.lt.s32.totalorder %s106_s12, %s106_s12 }
  0x12   :  { %v27_v6 = vmul.f32 1.442695, %v25_v4  ;;  %v29_v7 = vmul.f32 1.442695, %v26_v5 }
  0x13   :  { %p113_p8 = por %p112_p7, %p111_p6 }
  0x14   :  { %78 = vpow2.f32 %v27_v6 }
  0x15   :  { %80 = vpow2.f32 %v29_v7  ;;  %p114_p9 = pnand %p113_p8, %p107_p5 }
  0x21   :  { %v79_v8 = vpop.eup %78 }
  0x22   :  { %v81_v9 = vpop.eup %80  ;;  %v31_v10 = vmul.f32 %v79_v8, %v79_v8  ;;  %v39_v11 = vmul.f32 2.0, %v79_v8 }
  0x23   :  { %v32_v12 = vmul.f32 %v81_v9, %v81_v9  ;;  %v40_v13 = vmul.f32 2.0, %v81_v9 }
  0x24   :  { %v35_v14 = vsel %vm33_vm0, 1.0, %v31_v10  ;;  %v37_v15 = vsel %vm33_vm0, %v31_v10, 1.0 }
  0x25   :  { %v41_v16 = vadd.f32 %v39_v11, %v35_v14  ;;  %v43_v17 = vmul.f32 2.0, %v37_v15  ;;  %v36_v18 = vsel %vm34_vm1, 1.0, %v32_v12  ;;  %v38_v19 = vsel %vm34_vm1, %v32_v12, 1.0 }
  0x26   :  { %v42_v20 = vadd.f32 %v40_v13, %v36_v18  ;;  %v44_v21 = vmul.f32 2.0, %v38_v19 }
  0x27   :  { %v45_v22 = vadd.f32 %v43_v17, %v41_v16  ;;  %v55_v29 = vmul.f32 %v41_v16, %v21_v0 }
  0x28   :  { %v46_v23 = vadd.f32 %v44_v21, %v42_v20  ;;  %v56_v31 = vmul.f32 %v42_v20, %v22_v1 }
  0x29   :  { %82 = vrcp.f32 %v45_v22 }
  0x2a   :  { %84 = vrcp.f32 %v46_v23 }
  0x36   :  { %v83_v24 = vpop.eup %82 }
  0x37   :  { %v85_v25 = vpop.eup %84  ;;  %v49_v26 = vmul.f32 %v83_v24, %v45_v22 }
  0x38   :  { %v50_v27 = vmul.f32 %v85_v25, %v46_v23 }
  0x39   :  { %v51_v28 = vsub.f32 2.0, %v49_v26 }
  0x3a   :  { %v52_v30 = vsub.f32 2.0, %v50_v27 }
  0x3b   :  { %v53_v32 = vmul.f32 %v83_v24, %v51_v28 }
  0x3c   :  { %v54_v33 = vmul.f32 %v85_v25, %v52_v30 }
  0x3d   :  { %v57_v34 = vmul.f32 %v55_v29, %v53_v32 }
  0x3e   :  { %v58_v35 = vmul.f32 %v56_v31, %v54_v33 }
  0x3f   :  { %59 = vst [vmem:[#allocation5] sm:$0xff] %v57_v34 }
  0x40   :  { %60 = vst [vmem:[#allocation5 + $0x8] sm:$0xff] %v58_v35 }
  0x41   :  { %117 = shalt.err (!%p114_p9)
}
  0x42   :  { %70 = dma.vmem_to_hbm [thread:$0]  %s68_s11, 256, %s149_s1, [#allocation4]  }
  0x43   :  { %128 = dma.done.wait [#allocation4], 256  }
  0x44   :  { %129 = vsyncadd [#allocation4], 4294967040 }
  0x45   :  { %74 = vsyncpa [#allocation3], 1 }
  0x46   :  { %75 = vsyncpa [#allocation4], 1 }

</bundles_post_ra>
